<compile_context>
chip_gen: v6e
topology: v6e:2x2x1
jax: 0.10.0
libtpu: 0.0.40
codegen_flags: <defaults>
</compile_context>

<pallas_src>
import math
import functools

import jax
import jax.numpy as jnp
from jax import lax
from jax.experimental import pallas as pl
from jax.experimental.pallas import tpu as pltpu


# ---------------------------------------------------------------------------
# Fast path: small table -> VMEM-resident table, gather via one-hot x table
# on the MXU (no per-row DMAs).
# ---------------------------------------------------------------------------
def _embedding_vmem_kernel(idx_ref, table_ref, out_ref, *, vocab, scale):
    ids = idx_ref[...]                                     # (tb, 1) int32
    tb = ids.shape[0]
    iota = lax.broadcasted_iota(jnp.int32, (tb, vocab), 1)
    one_hot = (ids == iota).astype(table_ref.dtype)        # (tb, V)
    gathered = jnp.dot(one_hot, table_ref[...],
                       preferred_element_type=jnp.float32)  # (tb, D)
    out_ref[...] = (gathered * scale).astype(out_ref.dtype)


# ---------------------------------------------------------------------------
# Slow path: large table stays in HBM; one row DMA per token straight into the
# output block, a single aggregate wait, then an in-place sqrt(D) scale.
# ---------------------------------------------------------------------------
def _embedding_hbm_gather_kernel(idx_ref, table_hbm, out_ref, sem, *,
                                 token_block, scale):
    # idx_ref   : SMEM (N_pad,)           int32 (scalar-prefetched token ids)
    # table_hbm : HBM  (V, D)             float (never made VMEM-resident)
    # out_ref   : VMEM (token_block, D)   float (DMA landing buffer + output)
    # sem       : shared DMA semaphore (byte-counting) for all row copies
    base = pl.program_id(0) * token_block

    def issue(t, carry):
        row = idx_ref[base + t]
        pltpu.make_async_copy(
            table_hbm.at[pl.ds(row, 1)],      # (1, D) row in HBM
            out_ref.at[pl.ds(t, 1)],          # (1, D) row of the output block
            sem,
        ).start()
        return carry

    # Unrolled descriptor-issue loop: descriptor construction is the
    # saturating slot at small/medium D, so let LLO co-issue address math.
    lax.fori_loop(0, token_block, issue, 0, unroll=8)

    # Single aggregate wait: every row copy signals `sem` with its byte count
    # and every destination row lies inside out_ref, so one descriptor
    # spanning the whole (token_block, D) block waits for exactly the sum.
    pltpu.make_async_copy(out_ref, out_ref, sem).wait()

    # Fused sqrt(D) scale, in place (no extra scratch buffer).
    out_ref[...] = out_ref[...] * scale


def _round_up(x, m):
    return ((x + m - 1) // m) * m


def embedding_forward(indices, table, *, force_hbm_gather=False):
    """Equivalent to torch.nn.Embedding(V, D)(indices) * sqrt(D).

    indices: integer array of any shape; table: (V, D) float -> (*idx, D).
    """
    lead_shape = indices.shape
    V, D = table.shape
    N = 1
    for s in lead_shape:
        N *= int(s)
    scale = float(math.sqrt(D))

    # Out-of-range ids would otherwise become out-of-bounds row DMAs (chip
    # fault) or a zero one-hot row; clamp defensively (torch would raise).
    idx_flat = jnp.clip(indices.reshape(N).astype(jnp.int32), 0, V - 1)

    table_bytes = V * D * 4
    use_vmem_table = ((not force_hbm_gather)
                      and table_bytes <= (4 << 20)   # table fits VMEM budget
                      and V <= 4096)                 # keep one-hot tile sane

    n_tokens_rounded = max(8, _round_up(N, 8))

    if use_vmem_table:
        # Token tile bounded by the one-hot temp (tb*V*4) and the output
        # block (tb*D*4), ~2 MiB each; always a multiple of 8 sublanes.
        tb = min(1024, (2 << 20) // (4 * V), (2 << 20) // (4 * D))
        tb = max(8, (tb // 8) * 8)
        tb = min(tb, n_tokens_rounded)
        n_blocks = pl.cdiv(N, tb)
        N_pad = n_blocks * tb
        if N_pad != N:
            idx_flat = jnp.concatenate(
                [idx_flat, jnp.zeros((N_pad - N,), jnp.int32)])
        idx_col = idx_flat.reshape(N_pad, 1)

        kernel = functools.partial(_embedding_vmem_kernel, vocab=V, scale=scale)
        out_flat = pl.pallas_call(
            kernel,
            out_shape=jax.ShapeDtypeStruct((N_pad, D), table.dtype),
            grid_spec=pltpu.PrefetchScalarGridSpec(
                num_scalar_prefetch=0,
                grid=(n_blocks,),
                in_specs=[
                    pl.BlockSpec((tb, 1), lambda i: (i, 0)),   # token ids
                    pl.BlockSpec((V, D), lambda i: (0, 0)),    # VMEM-resident
                ],
                out_specs=pl.BlockSpec((tb, D), lambda i: (i, 0)),
            ),
            compiler_params=pltpu.CompilerParams(
                dimension_semantics=("parallel",)),
            cost_estimate=pl.CostEstimate(
                flops=2 * N_pad * V * D + N_pad * D,
                transcendentals=0,
                bytes_accessed=table_bytes + N_pad * D * 4 + N_pad * 4),
        )(idx_col, table)
    else:
        # HBM row-gather path.  ~2 MiB of gathered rows per tile amortizes the
        # per-step pipeline overhead; double-buffered output blocks stay well
        # inside the scoped-VMEM default on v5e/v6e/v7x.
        tb = (2 << 20) // (4 * D)
        tb = max(8, min(2048, (tb // 8) * 8))
        tb = min(tb, n_tokens_rounded)
        n_blocks = pl.cdiv(N, tb)
        N_pad = n_blocks * tb
        if N_pad != N:
            # Padded tokens gather row 0; their rows are sliced off below.
            idx_flat = jnp.concatenate(
                [idx_flat, jnp.zeros((N_pad - N,), jnp.int32)])

        kernel = functools.partial(
            _embedding_hbm_gather_kernel, token_block=tb, scale=scale)
        out_flat = pl.pallas_call(
            kernel,
            out_shape=jax.ShapeDtypeStruct((N_pad, D), table.dtype),
            grid_spec=pltpu.PrefetchScalarGridSpec(
                num_scalar_prefetch=1,                   # token ids -> SMEM
                grid=(n_blocks,),
                in_specs=[
                    pl.BlockSpec(memory_space=pl.ANY),   # table stays in HBM
                ],
                out_specs=pl.BlockSpec((tb, D), lambda i, idx: (i, 0)),
                scratch_shapes=[
                    pltpu.SemaphoreType.DMA(()),         # shared row-DMA sem
                ],
            ),
            compiler_params=pltpu.CompilerParams(
                dimension_semantics=("parallel",)),
            cost_estimate=pl.CostEstimate(
                flops=N_pad * D,                         # just the scale
                transcendentals=0,
                bytes_accessed=2 * N_pad * D * 4 + N_pad * 4),
        )(idx_flat, table)

    return out_flat[:N].reshape(*lead_shape, D)


if __name__ == "__main__":
    # Small shapes consistent with the module: vocab=64, model_dim=128,
    # batch=2, seq=8.
    vocab = 64
    model_dim = 128
    B, S = 2, 8

    key = jax.random.PRNGKey(0)
    k_tab, k_idx = jax.random.split(key)

    # torch.nn.Embedding default init is N(0, 1).
    table = jax.random.normal(k_tab, (vocab, model_dim), dtype=jnp.float32)
    indices = jax.random.randint(k_idx, (B, S), 0, vocab, dtype=jnp.int32)

    ref = table[indices] * math.sqrt(model_dim)

    # Default dispatch: small table -> VMEM-resident one-hot/MXU fast path.
    out_fast = jax.block_until_ready(embedding_forward(indices, table))
    assert out_fast.shape == (B, S, model_dim)
    assert jnp.allclose(out_fast, ref, atol=1e-5, rtol=1e-5)

    # Also exercise the HBM row-gather path (used for large tables) on the
    # same data to validate both code paths.
    out_gather = jax.block_until_ready(
        embedding_forward(indices, table, force_hbm_gather=True))
    assert out_gather.shape == (B, S, model_dim)
    assert jnp.allclose(out_gather, ref, atol=1e-5, rtol=1e-5)

    print("KERNEL_OK")
</pallas_src>

<mosaic_0001>
module attributes {stable_mosaic.version = 11 : i64} {
  func.func @_embedding_vmem_kernel(%arg0: i32, %arg1: memref<16x1xi32, #tpu.memory_space<vmem>>, %arg2: memref<64x128xf32, #tpu.memory_space<vmem>>, %arg3: memref<16x128xf32, #tpu.memory_space<vmem>>) attributes {dimension_semantics = [#tpu.dimension_semantics<parallel>], iteration_bounds = array<i64: 1>, scalar_prefetch = 0 : i64, scratch_operands = 0 : i64, tpu.core_type = #tpu.core_type<tc>, window_params = [{transform_indices = @transform_0, window_bounds = array<i64: 16, 1>}, {pipeline_mode = #tpu.pipeline_mode<synchronous>, transform_indices = @transform_1, window_bounds = array<i64: 64, 128>}, {transform_indices = @transform_2, window_bounds = array<i64: 16, 128>}]} {
    %c0 = arith.constant 0 : index
    %c0_0 = arith.constant 0 : index
    %0 = vector.load %arg1[%c0, %c0_0] : memref<16x1xi32, #tpu.memory_space<vmem>>, vector<16x1xi32>
    %1 = tpu.iota {dimensions = array<i32: 1>} : vector<16x64xi32>
    %2 = vector.broadcast %0 : vector<16x1xi32> to vector<16x64xi32>
    %3 = arith.cmpi eq, %2, %1 : vector<16x64xi32>
    %4 = arith.extui %3 : vector<16x64xi1> to vector<16x64xi32>
    %5 = arith.sitofp %4 : vector<16x64xi32> to vector<16x64xf32>
    %c0_1 = arith.constant 0 : index
    %c0_2 = arith.constant 0 : index
    %6 = vector.load %arg2[%c0_1, %c0_2] : memref<64x128xf32, #tpu.memory_space<vmem>>, vector<64x128xf32>
    %cst = arith.constant dense<0.000000e+00> : vector<16x128xf32>
    %7 = tpu.matmul %5, %6, %cst {dimension_numbers = #tpu.dot_dimension_numbers<[1], [0], [0], [1], [0, 0, 1, 1], [], []>} : vector<16x64xf32>, vector<64x128xf32>, vector<16x128xf32> -> vector<16x128xf32>
    %cst_3 = arith.constant 11.3137083 : f32
    %8 = vector.broadcast %cst_3 : f32 to vector<16x128xf32>
    %9 = arith.mulf %7, %8 : vector<16x128xf32>
    %c0_4 = arith.constant 0 : index
    %c0_5 = arith.constant 0 : index
    %10 = vector.load %arg3[%c0_4, %c0_5] : memref<16x128xf32, #tpu.memory_space<vmem>>, vector<16x128xf32>
    tpu.vector_store %arg3[%c0_4, %c0_5], %9 {strides = array<i32>} : memref<16x128xf32, #tpu.memory_space<vmem>>, vector<16x128xf32>,
    return
  }
  func.func @transform_0(%arg0: i32) -> (i32, i32) {
    %c0_i32 = arith.constant 0 : i32
    %c0_i32_0 = arith.constant 0 : i32
    return %arg0, %c0_i32 : i32, i32
  }
  func.func @transform_1(%arg0: i32) -> (i32, i32) {
    %c0_i32 = arith.constant 0 : i32
    %c0_i32_0 = arith.constant 0 : i32
    %c0_i32_1 = arith.constant 0 : i32
    return %c0_i32, %c0_i32_0 : i32, i32
  }
  func.func @transform_2(%arg0: i32) -> (i32, i32) {
    %c0_i32 = arith.constant 0 : i32
    %c0_i32_0 = arith.constant 0 : i32
    return %arg0, %c0_i32 : i32, i32
  }
}

</mosaic_0001>

<bundles_post_ra>
// kernel: tpu_custom_call.1
= control target key start
LH: loop header
LB: loop body
LE: loop exit
PB: predicated region body
PF: predicated region fallthrough
CT: control target
= control target key end

     0   :  { %7 = vsyncpa [#allocation3], 0  ;;  %s276_s0 = inlined_call_operand.vmem [shape: s32[16,1], index: 0, kind: input, shape index: {}]   ;;  %s277_s1 = inlined_call_operand.hbm [shape: f32[64,128], index: 1, kind: input, shape index: {}]   ;;  %s278_s2 = inlined_call_operand.hbm [shape: f32[16,128], index: 2, kind: output, shape index: {}]  }
   0x1   :  { %8 = vsyncpa [#allocation4], 0  ;;  %s237_s9 = smov [#allocation2]  }
   0x2   :  { %s16_s10 = sshll.u32 %s237_s9, 4  ;;  %s17_s10 = int_to_ptr.vmem [resolvable:$true] %s16_s10 }
   0x3   :  { %s201_s11 = scalar_lea.vmem %s17_s10, 1024  ;;  %p206_p1 = scmp.lt.s32.totalorder %s17_s10, %s17_s10 }
   0x4   :  { %p202_p0 = scmp.ne.s32.totalorder %s17_s10, %s201_s11  ;;  %p207_p2 = scmp.lt.s32.totalorder %s201_s11, %s201_s11 }
   0x6   :  { %p208_p3 = por %p207_p2, %p206_p1 }
   0x8   :  { %p209_p4 = pnand %p208_p3, %p202_p0 }
   0xa   :  { %212 = shalt.err (!%p209_p4)
}
   0xb   :  { %s238_s12 = smov 128   ;;  %s239_s13 = smov 8  }
   0xc   :  { %22 = dma.hbm_to_vmem [thread:$0]  %s277_s1, 1024, %s17_s10, [#allocation3], %s238_s12, %s238_s12, %s239_s13  }
   0xd   :  { %233 = dma.done.wait [#allocation3], 1024  }
   0xe   :  { %234 = vsyncadd [#allocation3], 4294966272  ;;  %v240_v0 = vmov 0   ;;  %v26_v1 = vld [vmem:[%s276_s0] sm:$0xff]  ;;  %v49_v2 = vld [vmem:[#allocation2 + $0x38] sm:$0xff]  ;;  %v28_v11 = vlaneseq  ;;  %vm50_vm0 = vcmask 523264  }
   0xf   :  { %192 = vset.pattern.permute.xlu0 %v240_v0  ;;  %167 = vmatprep.subr.mxu0 %v49_v2  ;;  %v48_v3 = vld [vmem:[#allocation2 + $0x30] sm:$0xff]  ;;  %v27_v4 = vld [vmem:[%s276_s0 + $0x8] sm:$0xff]  ;;  %v46_v6 = vld [vmem:[#allocation2 + $0x20] sm:$0xff]  ;;  %v241_v14 = vmov 0.0   ;;  %s242_s0 = smov [#allocation5]  }
  0x10   :  { %31 = vperm.xlu0 %192, %v26_v1   ;;  %168 = vmatpush3.msra.mxu0 %v49_v2  ;;  %v47_v5 = vld [vmem:[#allocation2 + $0x28] sm:$0xff]  ;;  %v45_v7 = vld [vmem:[#allocation2 + $0x18] sm:$0xff]  ;;  %v44_v8 = vld [vmem:[#allocation2 + $0x10] sm:$0xff]  ;;  %v29_v12 = vand.u32 127, %v28_v11  ;;  %s141_s1 = sshll.u32 %s242_s0, 4  ;;  %s142_s1 = int_to_ptr.vmem [resolvable:$true] %s141_s1 }
  0x11   :  { %169 = vmatprep.subr.mxu0 %v48_v3  ;;  %v43_v9 = vld [vmem:[#allocation2 + $0x8] sm:$0xff]  ;;  %v42_v10 = vld [vmem:[#allocation2] sm:$0xff]  ;;  %s213_s20 = scalar_lea.vmem %s142_s1, 256  ;;  %p218_p6 = scmp.lt.s32.totalorder %s142_s1, %s142_s1 }
  0x12   :  { %170 = vmatpush3.msra.mxu0 %v48_v3  ;;  %p214_p5 = scmp.ne.s32.totalorder %s142_s1, %s213_s20  ;;  %p219_p7 = scmp.lt.s32.totalorder %s213_s20, %s213_s20 }
  0x13   :  { %171 = vmatprep.subr.mxu0 %v47_v5 }
  0x14   :  { %34 = vperm.xlu0 %192, %v27_v4   ;;  %172 = vmatpush3.msra.mxu0 %v47_v5  ;;  %p220_p8 = por %p219_p7, %p218_p6 }
  0x15   :  { %173 = vmatprep.subr.mxu0 %v46_v6 }
  0x16   :  { %174 = vmatpush3.msra.mxu0 %v46_v6  ;;  %p221_p9 = pnand %p220_p8, %p214_p5 }
  0x17   :  { %175 = vmatprep.subr.mxu0 %v45_v7 }
  0x18   :  { %176 = vmatpush3.msra.mxu0 %v45_v7 }
  0x19   :  { %177 = vmatprep.subr.mxu0 %v44_v8 }
  0x1a   :  { %178 = vmatpush3.msra.mxu0 %v44_v8 }
  0x1b   :  { %179 = vmatprep.subr.mxu0 %v43_v9 }
  0x1c   :  { %180 = vmatpush3.msra.mxu0 %v43_v9 }
  0x1d   :  { %181 = vmatprep.subr.mxu0 %v42_v10 }
  0x1e   :  { %182 = vmatpush3.msra.mxu0 %v42_v10 }
  0x8b   :  { %v32_v13 = vpop.permute.xlu0 %31 }
  0x8c   :  { %vm36_vm1 = vcmp.eq.s32.totalorder %v32_v13, %v29_v12 }
  0x8d   :  { %v153_v15 = vsel %vm36_vm1, 1.0, %v241_v14 }
  0x8e   :  { %183 = vmatprep.mubr.msk.f32.mxu0 %vm50_vm0, %v153_v15 }
  0x8f   :  { %v35_v16 = vpop.permute.xlu0 %34 }
  0x90   :  { %vm37_vm2 = vcmp.eq.s32.totalorder %v35_v16, %v29_v12 }
  0x91   :  { %v154_v17 = vsel %vm37_vm2, 1.0, %v241_v14 }
  0x92   :  { %184 = vmatmul.mubr.msk.f32.vlgmr.msra.gmra.mxu0 %vm50_vm0, %v154_v17 }
 0x152   :  { %v185_v18 = vpop.f32.mrf.mxu0 }
 0x153   :  { %v133_v19 = vmul.f32 11.313708, %v185_v18 }
 0x154   :  { %v123_v20 = vpop.f32.mrf.mxu0 }
 0x155   :  { %135 = vst [vmem:[#allocation5 + $0x8] sm:$0xff] %v133_v19  ;;  %v132_v21 = vmul.f32 11.313708, %v123_v20 }
 0x157   :  { %134 = vst [vmem:[#allocation5] sm:$0xff] %v132_v21 }
 0x158   :  { %224 = shalt.err (!%p221_p9)
}
 0x159   :  { %147 = dma.vmem_to_hbm [thread:$0]  %s142_s1, 256, %s278_s2, [#allocation4], %s238_s12, %s238_s12, %s239_s13  }
 0x15a   :  { %235 = dma.done.wait [#allocation4], 256  }
 0x15b   :  { %236 = vsyncadd [#allocation4], 4294967040 }
 0x15c   :  { %151 = vsyncpa [#allocation3], 1 }
 0x15d   :  { %152 = vsyncpa [#allocation4], 1 }

</bundles_post_ra>
